<compile_context>
chip_gen: v5e
topology: v5e:2x2
jax: 0.10.0
libtpu: 0.0.40
codegen_flags: <defaults>
</compile_context>

<pallas_src>
import jax
import jax.numpy as jnp
from jax.experimental import pallas as pl
from jax.experimental.pallas import tpu as pltpu

LN_EPS = 1e-5


def _round_up(x, m):
    return (x + m - 1) // m * m


def _layernorm_ref(x, gamma, beta):
    # Two-pass form, faithful to nn.LayerNorm (used by the pure-JAX reference).
    mu = jnp.mean(x, axis=-1, keepdims=True)
    var = jnp.mean((x - mu) ** 2, axis=-1, keepdims=True)
    return (x - mu) * jax.lax.rsqrt(var + LN_EPS) * gamma + beta


def _layernorm_fused(x, gamma, beta):
    # One-pass form: var = E[x^2] - E[x]^2 (saves a full-width subtract pass).
    mu = jnp.mean(x, axis=-1, keepdims=True)
    ms = jnp.mean(x * x, axis=-1, keepdims=True)
    var = jnp.maximum(ms - mu * mu, 0.0)
    return (x - mu) * jax.lax.rsqrt(var + LN_EPS) * gamma + beta


def add_z_mlp_kernel(feat_ref, z_ref,
                     w1_ref, b1_ref, w2_ref, b2_ref, g1_ref, be1_ref,
                     w3f_ref, w3z_ref, b3_ref, g2_ref, be2_ref,
                     out_ref):
    f32 = jnp.float32
    mm_dtype = w1_ref.dtype            # matmul operand dtype (bf16 by default)

    # Hoist the small (1, N) vectors once, in f32.
    b1 = b1_ref[...].astype(f32)
    b2 = b2_ref[...].astype(f32)
    b3 = b3_ref[...].astype(f32)
    g1, be1 = g1_ref[...].astype(f32), be1_ref[...].astype(f32)
    g2, be2 = g2_ref[...].astype(f32), be2_ref[...].astype(f32)

    # ----- z_mlp: Linear -> ReLU -> Linear -> ReLU -> LayerNorm -----
    z = z_ref[...].astype(mm_dtype)
    h = jnp.dot(z, w1_ref[...], preferred_element_type=f32) + b1
    h = jnp.maximum(h, 0.0)                                       # ReLU (f32)
    h = jnp.dot(h.astype(mm_dtype), w2_ref[...], preferred_element_type=f32) + b2
    h = jnp.maximum(h, 0.0)                                       # ReLU (f32)
    z_feature = _layernorm_fused(h, g1, be1)

    # ----- post_mlp: split-K matmul (no lane concat, no feature f32 pass) -----
    f = feat_ref[...].astype(mm_dtype)
    y = (jnp.dot(f, w3f_ref[...], preferred_element_type=f32)
         + jnp.dot(z_feature.astype(mm_dtype), w3z_ref[...],
                   preferred_element_type=f32)
         + b3)
    y = jnp.maximum(y, 0.0)                                       # ReLU (f32)
    y = _layernorm_fused(y, g2, be2)

    out_ref[...] = y.astype(out_ref.dtype)


def add_z_mlp(feature, z, params, *, block_b=None, matmul_dtype=jnp.bfloat16,
              buffer_depth=None):
    """Fused Add_Z_MLP forward.

    Output dtype follows `feature.dtype` — feed bf16 activations to get bf16
    HBM traffic end-to-end (the kernel computes LayerNorm/accumulation in f32
    either way).
    """
    B, feature_dim = feature.shape
    Bz, z_dim = z.shape
    assert Bz == B
    hidden_dim = params["w1"].shape[1]
    output_dim = params["w3"].shape[1]
    out_dtype = feature.dtype

    # --- Batch tiling heuristic ---------------------------------------------
    # Big tiles (up to 8192 rows/step) amortize the ~0.35us/step overhead on
    # this HBM-bound kernel.  Keep >=2 steps once B>=2048 so v7x's two
    # TensorCores both get work, and >=4 steps once B>=8192 for pipelining.
    if block_b is None:
        cap = 8192
        if B >= 8192:
            min_steps = 4
        elif B >= 2048:
            min_steps = 2
        else:
            min_steps = 1
        n_blocks = max(pl.cdiv(B, cap), min_steps)
        block_b = _round_up(pl.cdiv(B, n_blocks), 8)
    block_b = max(8, _round_up(block_b, 8))

    Bp = _round_up(B, block_b)
    if Bp != B:                       # remainder handling: zero-pad the batch
        feature = jnp.pad(feature, ((0, Bp - B), (0, 0)))
        z = jnp.pad(z, ((0, Bp - B), (0, 0)))
    grid = (Bp // block_b,)

    # MXU operands in bf16; w3 pre-split so the kernel never builds the concat.
    w1 = params["w1"].astype(matmul_dtype)
    w2 = params["w2"].astype(matmul_dtype)
    w3f = params["w3"][:feature_dim].astype(matmul_dtype)
    w3z = params["w3"][feature_dim:].astype(matmul_dtype)
    b1, b2, b3 = params["b1"], params["b2"], params["b3"]
    g1, be1, g2, be2 = params["g1"], params["be1"], params["g2"], params["be2"]

    def batch_map(i):
        return (i, 0)

    def const_map(i):
        return (0, 0)

    def full(a):                      # grid-invariant, whole-array block
        return pl.BlockSpec(a.shape, const_map)

    stream_mode = pl.Buffered(buffer_depth) if buffer_depth is not None else None

    def stream_spec(cols):
        if stream_mode is None:
            return pl.BlockSpec((block_b, cols), batch_map)
        return pl.BlockSpec((block_b, cols), batch_map, pipeline_mode=stream_mode)

    in_specs = [
        stream_spec(feature_dim),
        stream_spec(z_dim),
        full(w1), full(b1),
        full(w2), full(b2),
        full(g1), full(be1),
        full(w3f), full(w3z), full(b3),
        full(g2), full(be2),
    ]
    out_spec = pl.BlockSpec((block_b, output_dim), batch_map)

    def nbytes(a):
        return int(a.size) * a.dtype.itemsize

    # --- VMEM budget: explicit limit (v5e default scoped is only 16 MiB) -----
    weights_bytes = sum(nbytes(a) for a in
                        (w1, w2, w3f, w3z, b1, b2, b3, g1, be1, g2, be2))
    bytes_per_row = (feature_dim * feature.dtype.itemsize
                     + z_dim * z.dtype.itemsize
                     + output_dim * jnp.dtype(out_dtype).itemsize)
    bufs = 2 if buffer_depth is None else max(2, buffer_depth)
    stream_bytes = bufs * block_b * bytes_per_row
    body_bytes = 4 * block_b * max(hidden_dim, output_dim) * 4   # f32 intermediates
    vmem_needed = stream_bytes + 2 * weights_bytes + body_bytes
    vmem_limit = int(min(48 << 20, max(16 << 20, 2 * vmem_needed)))

    flops = 2 * Bp * (z_dim * hidden_dim
                      + hidden_dim * hidden_dim
                      + (feature_dim + hidden_dim) * output_dim)
    bytes_accessed = (nbytes(feature) + nbytes(z) + weights_bytes
                      + Bp * output_dim * jnp.dtype(out_dtype).itemsize)

    out = pl.pallas_call(
        add_z_mlp_kernel,
        out_shape=jax.ShapeDtypeStruct((Bp, output_dim), out_dtype),
        grid_spec=pltpu.PrefetchScalarGridSpec(
            num_scalar_prefetch=0,
            grid=grid,
            in_specs=in_specs,
            out_specs=out_spec,
        ),
        compiler_params=pltpu.CompilerParams(
            dimension_semantics=("parallel",),
            vmem_limit_bytes=vmem_limit),
        cost_estimate=pl.CostEstimate(
            flops=flops,
            transcendentals=2 * Bp,          # one rsqrt per row per LayerNorm
            bytes_accessed=bytes_accessed),
    )(feature, z,
      w1, b1, w2, b2, g1, be1,
      w3f, w3z, b3, g2, be2)

    return out[:B] if Bp != B else out


def init_params(key, feature_dim, z_dim, hidden_dim, output_dim):
    """Deterministic synthetic init (PyTorch-Linear-like uniform bounds)."""
    ks = jax.random.split(key, 3)

    def lin(k, fan_in, fan_out):
        bound = 1.0 / jnp.sqrt(fan_in)
        kw, kb = jax.random.split(k)
        w = jax.random.uniform(kw, (fan_in, fan_out), jnp.float32, -bound, bound)
        b = jax.random.uniform(kb, (1, fan_out), jnp.float32, -bound, bound)
        return w, b

    w1, b1 = lin(ks[0], z_dim, hidden_dim)
    w2, b2 = lin(ks[1], hidden_dim, hidden_dim)
    w3, b3 = lin(ks[2], feature_dim + hidden_dim, output_dim)
    return {
        "w1": w1, "b1": b1,
        "w2": w2, "b2": b2,
        "g1": jnp.ones((1, hidden_dim), jnp.float32),
        "be1": jnp.zeros((1, hidden_dim), jnp.float32),
        "w3": w3, "b3": b3,
        "g2": jnp.ones((1, output_dim), jnp.float32),
        "be2": jnp.zeros((1, output_dim), jnp.float32),
    }


def reference_forward(feature, z, p, matmul_dtype=None):
    """Pure-JAX reference matching the PyTorch module semantics.

    If matmul_dtype is given, matmul operands are cast to it (accumulation in
    f32), mirroring the kernel's mixed precision.
    """
    def mm(x, w):
        if matmul_dtype is not None:
            x, w = x.astype(matmul_dtype), w.astype(matmul_dtype)
        return jnp.dot(x, w, preferred_element_type=jnp.float32)

    h = jnp.maximum(mm(z, p["w1"]) + p["b1"], 0.0)
    h = jnp.maximum(mm(h, p["w2"]) + p["b2"], 0.0)
    zf = _layernorm_ref(h, p["g1"], p["be1"])
    cat = jnp.concatenate([feature, zf], axis=-1)
    y = jnp.maximum(mm(cat, p["w3"]) + p["b3"], 0.0)
    return _layernorm_ref(y, p["g2"], p["be2"])


if __name__ == "__main__":
    # Small shapes consistent with the module's forward.
    B, feature_dim, z_dim, hidden_dim, output_dim = 16, 32, 16, 32, 32

    key = jax.random.PRNGKey(0)
    k_feat, k_z, k_params = jax.random.split(key, 3)

    feature = jax.random.normal(k_feat, (B, feature_dim), jnp.float32)
    z = jax.random.normal(k_z, (B, z_dim), jnp.float32)
    params = init_params(k_params, feature_dim, z_dim, hidden_dim, output_dim)

    out = jax.block_until_ready(add_z_mlp(feature, z, params))
    assert out.shape == (B, output_dim)

    # Tight check vs a reference emulating the same bf16-matmul / f32-LN mix.
    ref_mixed = reference_forward(feature, z, params, matmul_dtype=jnp.bfloat16)
    assert jnp.allclose(out, ref_mixed, atol=2e-3, rtol=2e-3), "mismatch (mixed ref)"
    # Loose check vs the pure-f32 PyTorch-semantics reference (bf16 MXU inputs).
    ref_f32 = reference_forward(feature, z, params)
    assert jnp.allclose(out, ref_f32, atol=1e-1, rtol=1e-1), "mismatch (f32 ref)"

    # Ragged batch: exercises wrapper-side padding / remainder handling.
    B2 = 20
    f2 = jax.random.normal(jax.random.PRNGKey(1), (B2, feature_dim), jnp.float32)
    z2 = jax.random.normal(jax.random.PRNGKey(2), (B2, z_dim), jnp.float32)
    out2 = jax.block_until_ready(add_z_mlp(f2, z2, params))
    assert out2.shape == (B2, output_dim)
    ref2 = reference_forward(f2, z2, params, matmul_dtype=jnp.bfloat16)
    assert jnp.allclose(out2, ref2, atol=2e-3, rtol=2e-3), "mismatch (ragged)"

    # Larger ragged batch: exercises the multi-step grid (>=2 tiles, megacore
    # path) together with padding.
    B3 = 2500
    f3 = jax.random.normal(jax.random.PRNGKey(3), (B3, feature_dim), jnp.float32)
    z3 = jax.random.normal(jax.random.PRNGKey(4), (B3, z_dim), jnp.float32)
    out3 = jax.block_until_ready(add_z_mlp(f3, z3, params))
    assert out3.shape == (B3, output_dim)
    ref3 = reference_forward(f3, z3, params, matmul_dtype=jnp.bfloat16)
    assert jnp.allclose(out3, ref3, atol=2e-3, rtol=2e-3), "mismatch (multi-tile)"

    print("KERNEL_OK")
</pallas_src>

<mosaic_0001>
module attributes {stable_mosaic.version = 11 : i64} {
  func.func @add_z_mlp_kernel(%arg0: i32, %arg1: memref<16x32xf32, #tpu.memory_space<vmem>>, %arg2: memref<16x16xf32, #tpu.memory_space<vmem>>, %arg3: memref<16x32xbf16, #tpu.memory_space<vmem>>, %arg4: memref<1x32xf32, #tpu.memory_space<vmem>>, %arg5: memref<32x32xbf16, #tpu.memory_space<vmem>>, %arg6: memref<1x32xf32, #tpu.memory_space<vmem>>, %arg7: memref<1x32xf32, #tpu.memory_space<vmem>>, %arg8: memref<1x32xf32, #tpu.memory_space<vmem>>, %arg9: memref<32x32xbf16, #tpu.memory_space<vmem>>, %arg10: memref<32x32xbf16, #tpu.memory_space<vmem>>, %arg11: memref<1x32xf32, #tpu.memory_space<vmem>>, %arg12: memref<1x32xf32, #tpu.memory_space<vmem>>, %arg13: memref<1x32xf32, #tpu.memory_space<vmem>>, %arg14: memref<16x32xf32, #tpu.memory_space<vmem>>) attributes {dimension_semantics = [#tpu.dimension_semantics<parallel>], iteration_bounds = array<i64: 1>, scalar_prefetch = 0 : i64, scratch_operands = 0 : i64, tpu.core_type = #tpu.core_type<tc>, window_params = [{transform_indices = @transform_0, window_bounds = array<i64: 16, 32>}, {transform_indices = @transform_1, window_bounds = array<i64: 16, 16>}, {pipeline_mode = #tpu.pipeline_mode<synchronous>, transform_indices = @transform_2, window_bounds = array<i64: 16, 32>}, {pipeline_mode = #tpu.pipeline_mode<synchronous>, transform_indices = @transform_3, window_bounds = array<i64: 1, 32>}, {pipeline_mode = #tpu.pipeline_mode<synchronous>, transform_indices = @transform_4, window_bounds = array<i64: 32, 32>}, {pipeline_mode = #tpu.pipeline_mode<synchronous>, transform_indices = @transform_5, window_bounds = array<i64: 1, 32>}, {pipeline_mode = #tpu.pipeline_mode<synchronous>, transform_indices = @transform_6, window_bounds = array<i64: 1, 32>}, {pipeline_mode = #tpu.pipeline_mode<synchronous>, transform_indices = @transform_7, window_bounds = array<i64: 1, 32>}, {pipeline_mode = #tpu.pipeline_mode<synchronous>, transform_indices = @transform_8, window_bounds = array<i64: 32, 32>}, {pipeline_mode = #tpu.pipeline_mode<synchronous>, transform_indices = @transform_9, window_bounds = array<i64: 32, 32>}, {pipeline_mode = #tpu.pipeline_mode<synchronous>, transform_indices = @transform_10, window_bounds = array<i64: 1, 32>}, {pipeline_mode = #tpu.pipeline_mode<synchronous>, transform_indices = @transform_11, window_bounds = array<i64: 1, 32>}, {pipeline_mode = #tpu.pipeline_mode<synchronous>, transform_indices = @transform_12, window_bounds = array<i64: 1, 32>}, {transform_indices = @transform_13, window_bounds = array<i64: 16, 32>}]} {
    %c0 = arith.constant 0 : index
    %c0_0 = arith.constant 0 : index
    %0 = vector.load %arg4[%c0, %c0_0] : memref<1x32xf32, #tpu.memory_space<vmem>>, vector<1x32xf32>
    %c0_1 = arith.constant 0 : index
    %c0_2 = arith.constant 0 : index
    %1 = vector.load %arg6[%c0_1, %c0_2] : memref<1x32xf32, #tpu.memory_space<vmem>>, vector<1x32xf32>
    %c0_3 = arith.constant 0 : index
    %c0_4 = arith.constant 0 : index
    %2 = vector.load %arg11[%c0_3, %c0_4] : memref<1x32xf32, #tpu.memory_space<vmem>>, vector<1x32xf32>
    %c0_5 = arith.constant 0 : index
    %c0_6 = arith.constant 0 : index
    %3 = vector.load %arg7[%c0_5, %c0_6] : memref<1x32xf32, #tpu.memory_space<vmem>>, vector<1x32xf32>
    %c0_7 = arith.constant 0 : index
    %c0_8 = arith.constant 0 : index
    %4 = vector.load %arg8[%c0_7, %c0_8] : memref<1x32xf32, #tpu.memory_space<vmem>>, vector<1x32xf32>
    %c0_9 = arith.constant 0 : index
    %c0_10 = arith.constant 0 : index
    %5 = vector.load %arg12[%c0_9, %c0_10] : memref<1x32xf32, #tpu.memory_space<vmem>>, vector<1x32xf32>
    %c0_11 = arith.constant 0 : index
    %c0_12 = arith.constant 0 : index
    %6 = vector.load %arg13[%c0_11, %c0_12] : memref<1x32xf32, #tpu.memory_space<vmem>>, vector<1x32xf32>
    %c0_13 = arith.constant 0 : index
    %c0_14 = arith.constant 0 : index
    %7 = vector.load %arg2[%c0_13, %c0_14] : memref<16x16xf32, #tpu.memory_space<vmem>>, vector<16x16xf32>
    %8 = arith.truncf %7 : vector<16x16xf32> to vector<16x16xbf16>
    %c0_15 = arith.constant 0 : index
    %c0_16 = arith.constant 0 : index
    %9 = vector.load %arg3[%c0_15, %c0_16] : memref<16x32xbf16, #tpu.memory_space<vmem>>, vector<16x32xbf16>
    %cst = arith.constant dense<0.000000e+00> : vector<16x32xf32>
    %10 = tpu.matmul %8, %9, %cst {dimension_numbers = #tpu.dot_dimension_numbers<[1], [0], [0], [1], [0, 0, 1, 1], [], []>} : vector<16x16xbf16>, vector<16x32xbf16>, vector<16x32xf32> -> vector<16x32xf32>
    %11 = vector.broadcast %0 : vector<1x32xf32> to vector<16x32xf32>
    %12 = arith.addf %10, %11 : vector<16x32xf32>
    %cst_17 = arith.constant 0.000000e+00 : f32
    %13 = vector.broadcast %cst_17 : f32 to vector<16x32xf32>
    %14 = arith.maximumf %12, %13 : vector<16x32xf32>
    %15 = arith.truncf %14 : vector<16x32xf32> to vector<16x32xbf16>
    %c0_18 = arith.constant 0 : index
    %c0_19 = arith.constant 0 : index
    %16 = vector.load %arg5[%c0_18, %c0_19] : memref<32x32xbf16, #tpu.memory_space<vmem>>, vector<32x32xbf16>
    %cst_20 = arith.constant dense<0.000000e+00> : vector<16x32xf32>
    %17 = tpu.matmul %15, %16, %cst_20 {dimension_numbers = #tpu.dot_dimension_numbers<[1], [0], [0], [1], [0, 0, 1, 1], [], []>} : vector<16x32xbf16>, vector<32x32xbf16>, vector<16x32xf32> -> vector<16x32xf32>
    %18 = vector.broadcast %1 : vector<1x32xf32> to vector<16x32xf32>
    %19 = arith.addf %17, %18 : vector<16x32xf32>
    %cst_21 = arith.constant 0.000000e+00 : f32
    %20 = vector.broadcast %cst_21 : f32 to vector<16x32xf32>
    %21 = arith.maximumf %19, %20 : vector<16x32xf32>
    %cst_22 = arith.constant dense<0.000000e+00> : vector<16xf32>
    %22 = vector.multi_reduction <add>, %21, %cst_22 [1] : vector<16x32xf32> to vector<16xf32>
    %23 = vector.shape_cast %22 : vector<16xf32> to vector<16x1xf32>
    %cst_23 = arith.constant 3.200000e+01 : f32
    %24 = vector.broadcast %cst_23 : f32 to vector<16x1xf32>
    %25 = arith.divf %23, %24 : vector<16x1xf32>
    %26 = arith.mulf %21, %21 : vector<16x32xf32>
    %cst_24 = arith.constant dense<0.000000e+00> : vector<16xf32>
    %27 = vector.multi_reduction <add>, %26, %cst_24 [1] : vector<16x32xf32> to vector<16xf32>
    %28 = vector.shape_cast %27 : vector<16xf32> to vector<16x1xf32>
    %cst_25 = arith.constant 3.200000e+01 : f32
    %29 = vector.broadcast %cst_25 : f32 to vector<16x1xf32>
    %30 = arith.divf %28, %29 : vector<16x1xf32>
    %31 = arith.mulf %25, %25 : vector<16x1xf32>
    %32 = arith.subf %30, %31 : vector<16x1xf32>
    %cst_26 = arith.constant 0.000000e+00 : f32
    %33 = vector.broadcast %cst_26 : f32 to vector<16x1xf32>
    %34 = arith.maximumf %32, %33 : vector<16x1xf32>
    %35 = vector.broadcast %25 : vector<16x1xf32> to vector<16x32xf32>
    %36 = arith.subf %21, %35 : vector<16x32xf32>
    %cst_27 = arith.constant 9.99999974E-6 : f32
    %37 = vector.broadcast %cst_27 : f32 to vector<16x1xf32>
    %38 = arith.addf %34, %37 : vector<16x1xf32>
    %39 = math.rsqrt %38 : vector<16x1xf32>
    %40 = vector.broadcast %39 : vector<16x1xf32> to vector<16x32xf32>
    %41 = arith.mulf %36, %40 : vector<16x32xf32>
    %42 = vector.broadcast %3 : vector<1x32xf32> to vector<16x32xf32>
    %43 = arith.mulf %41, %42 : vector<16x32xf32>
    %44 = vector.broadcast %4 : vector<1x32xf32> to vector<16x32xf32>
    %45 = arith.addf %43, %44 : vector<16x32xf32>
    %c0_28 = arith.constant 0 : index
    %c0_29 = arith.constant 0 : index
    %46 = vector.load %arg1[%c0_28, %c0_29] : memref<16x32xf32, #tpu.memory_space<vmem>>, vector<16x32xf32>
    %47 = arith.truncf %46 : vector<16x32xf32> to vector<16x32xbf16>
    %c0_30 = arith.constant 0 : index
    %c0_31 = arith.constant 0 : index
    %48 = vector.load %arg9[%c0_30, %c0_31] : memref<32x32xbf16, #tpu.memory_space<vmem>>, vector<32x32xbf16>
    %cst_32 = arith.constant dense<0.000000e+00> : vector<16x32xf32>
    %49 = tpu.matmul %47, %48, %cst_32 {dimension_numbers = #tpu.dot_dimension_numbers<[1], [0], [0], [1], [0, 0, 1, 1], [], []>} : vector<16x32xbf16>, vector<32x32xbf16>, vector<16x32xf32> -> vector<16x32xf32>
    %50 = arith.truncf %45 : vector<16x32xf32> to vector<16x32xbf16>
    %c0_33 = arith.constant 0 : index
    %c0_34 = arith.constant 0 : index
    %51 = vector.load %arg10[%c0_33, %c0_34] : memref<32x32xbf16, #tpu.memory_space<vmem>>, vector<32x32xbf16>
    %cst_35 = arith.constant dense<0.000000e+00> : vector<16x32xf32>
    %52 = tpu.matmul %50, %51, %cst_35 {dimension_numbers = #tpu.dot_dimension_numbers<[1], [0], [0], [1], [0, 0, 1, 1], [], []>} : vector<16x32xbf16>, vector<32x32xbf16>, vector<16x32xf32> -> vector<16x32xf32>
    %53 = arith.addf %49, %52 : vector<16x32xf32>
    %54 = vector.broadcast %2 : vector<1x32xf32> to vector<16x32xf32>
    %55 = arith.addf %53, %54 : vector<16x32xf32>
    %cst_36 = arith.constant 0.000000e+00 : f32
    %56 = vector.broadcast %cst_36 : f32 to vector<16x32xf32>
    %57 = arith.maximumf %55, %56 : vector<16x32xf32>
    %cst_37 = arith.constant dense<0.000000e+00> : vector<16xf32>
    %58 = vector.multi_reduction <add>, %57, %cst_37 [1] : vector<16x32xf32> to vector<16xf32>
    %59 = vector.shape_cast %58 : vector<16xf32> to vector<16x1xf32>
    %cst_38 = arith.constant 3.200000e+01 : f32
    %60 = vector.broadcast %cst_38 : f32 to vector<16x1xf32>
    %61 = arith.divf %59, %60 : vector<16x1xf32>
    %62 = arith.mulf %57, %57 : vector<16x32xf32>
    %cst_39 = arith.constant dense<0.000000e+00> : vector<16xf32>
    %63 = vector.multi_reduction <add>, %62, %cst_39 [1] : vector<16x32xf32> to vector<16xf32>
    %64 = vector.shape_cast %63 : vector<16xf32> to vector<16x1xf32>
    %cst_40 = arith.constant 3.200000e+01 : f32
    %65 = vector.broadcast %cst_40 : f32 to vector<16x1xf32>
    %66 = arith.divf %64, %65 : vector<16x1xf32>
    %67 = arith.mulf %61, %61 : vector<16x1xf32>
    %68 = arith.subf %66, %67 : vector<16x1xf32>
    %cst_41 = arith.constant 0.000000e+00 : f32
    %69 = vector.broadcast %cst_41 : f32 to vector<16x1xf32>
    %70 = arith.maximumf %68, %69 : vector<16x1xf32>
    %71 = vector.broadcast %61 : vector<16x1xf32> to vector<16x32xf32>
    %72 = arith.subf %57, %71 : vector<16x32xf32>
    %cst_42 = arith.constant 9.99999974E-6 : f32
    %73 = vector.broadcast %cst_42 : f32 to vector<16x1xf32>
    %74 = arith.addf %70, %73 : vector<16x1xf32>
    %75 = math.rsqrt %74 : vector<16x1xf32>
    %76 = vector.broadcast %75 : vector<16x1xf32> to vector<16x32xf32>
    %77 = arith.mulf %72, %76 : vector<16x32xf32>
    %78 = vector.broadcast %5 : vector<1x32xf32> to vector<16x32xf32>
    %79 = arith.mulf %77, %78 : vector<16x32xf32>
    %80 = vector.broadcast %6 : vector<1x32xf32> to vector<16x32xf32>
    %81 = arith.addf %79, %80 : vector<16x32xf32>
    %c0_43 = arith.constant 0 : index
    %c0_44 = arith.constant 0 : index
    %82 = vector.load %arg14[%c0_43, %c0_44] : memref<16x32xf32, #tpu.memory_space<vmem>>, vector<16x32xf32>
    tpu.vector_store %arg14[%c0_43, %c0_44], %81 {strides = array<i32>} : memref<16x32xf32, #tpu.memory_space<vmem>>, vector<16x32xf32>,
    return
  }
  func.func @transform_0(%arg0: i32) -> (i32, i32) {
    %c0_i32 = arith.constant 0 : i32
    %c0_i32_0 = arith.constant 0 : i32
    return %arg0, %c0_i32 : i32, i32
  }
  func.func @transform_1(%arg0: i32) -> (i32, i32) {
    %c0_i32 = arith.constant 0 : i32
    %c0_i32_0 = arith.constant 0 : i32
    return %arg0, %c0_i32 : i32, i32
  }
  func.func @transform_2(%arg0: i32) -> (i32, i32) {
    %c0_i32 = arith.constant 0 : i32
    %c0_i32_0 = arith.constant 0 : i32
    %c0_i32_1 = arith.constant 0 : i32
    return %c0_i32, %c0_i32_0 : i32, i32
  }
  func.func @transform_3(%arg0: i32) -> (i32, i32) {
    %c0_i32 = arith.constant 0 : i32
    %c0_i32_0 = arith.constant 0 : i32
    %c0_i32_1 = arith.constant 0 : i32
    return %c0_i32, %c0_i32_0 : i32, i32
  }
  func.func @transform_4(%arg0: i32) -> (i32, i32) {
    %c0_i32 = arith.constant 0 : i32
    %c0_i32_0 = arith.constant 0 : i32
    %c0_i32_1 = arith.constant 0 : i32
    return %c0_i32, %c0_i32_0 : i32, i32
  }
  func.func @transform_5(%arg0: i32) -> (i32, i32) {
    %c0_i32 = arith.constant 0 : i32
    %c0_i32_0 = arith.constant 0 : i32
    %c0_i32_1 = arith.constant 0 : i32
    return %c0_i32, %c0_i32_0 : i32, i32
  }
  func.func @transform_6(%arg0: i32) -> (i32, i32) {
    %c0_i32 = arith.constant 0 : i32
    %c0_i32_0 = arith.constant 0 : i32
    %c0_i32_1 = arith.constant 0 : i32
    return %c0_i32, %c0_i32_0 : i32, i32
  }
  func.func @transform_7(%arg0: i32) -> (i32, i32) {
    %c0_i32 = arith.constant 0 : i32
    %c0_i32_0 = arith.constant 0 : i32
    %c0_i32_1 = arith.constant 0 : i32
    return %c0_i32, %c0_i32_0 : i32, i32
  }
  func.func @transform_8(%arg0: i32) -> (i32, i32) {
    %c0_i32 = arith.constant 0 : i32
    %c0_i32_0 = arith.constant 0 : i32
    %c0_i32_1 = arith.constant 0 : i32
    return %c0_i32, %c0_i32_0 : i32, i32
  }
  func.func @transform_9(%arg0: i32) -> (i32, i32) {
    %c0_i32 = arith.constant 0 : i32
    %c0_i32_0 = arith.constant 0 : i32
    %c0_i32_1 = arith.constant 0 : i32
    return %c0_i32, %c0_i32_0 : i32, i32
  }
  func.func @transform_10(%arg0: i32) -> (i32, i32) {
    %c0_i32 = arith.constant 0 : i32
    %c0_i32_0 = arith.constant 0 : i32
    %c0_i32_1 = arith.constant 0 : i32
    return %c0_i32, %c0_i32_0 : i32, i32
  }
  func.func @transform_11(%arg0: i32) -> (i32, i32) {
    %c0_i32 = arith.constant 0 : i32
    %c0_i32_0 = arith.constant 0 : i32
    %c0_i32_1 = arith.constant 0 : i32
    return %c0_i32, %c0_i32_0 : i32, i32
  }
  func.func @transform_12(%arg0: i32) -> (i32, i32) {
    %c0_i32 = arith.constant 0 : i32
    %c0_i32_0 = arith.constant 0 : i32
    %c0_i32_1 = arith.constant 0 : i32
    return %c0_i32, %c0_i32_0 : i32, i32
  }
  func.func @transform_13(%arg0: i32) -> (i32, i32) {
    %c0_i32 = arith.constant 0 : i32
    %c0_i32_0 = arith.constant 0 : i32
    return %arg0, %c0_i32 : i32, i32
  }
}

</mosaic_0001>

<bundles_post_ra>
// kernel: tpu_custom_call.1
= control target key start
LH: loop header
LB: loop body
LE: loop exit
PB: predicated region body
PF: predicated region fallthrough
CT: control target
= control target key end

     0   :  { %18 = vsyncpa [#allocation3], 0  ;;  %s863_s0 = inlined_call_operand.hbm [shape: f32[16,32], index: 0, kind: input, shape index: {}]   ;;  %s864_s1 = inlined_call_operand.hbm [shape: f32[16,16], index: 1, kind: input, shape index: {}]   ;;  %s865_s2 = inlined_call_operand.hbm [shape: bf16[16,32], index: 2, kind: input, shape index: {}]   ;;  %s866_s3 = inlined_call_operand.vmem [shape: f32[1,32], index: 3, kind: input, shape index: {}]   ;;  %s867_s4 = inlined_call_operand.hbm [shape: bf16[32,32], index: 4, kind: input, shape index: {}]   ;;  %s868_s5 = inlined_call_operand.vmem [shape: f32[1,32], index: 5, kind: input, shape index: {}]   ;;  %s869_s6 = inlined_call_operand.vmem [shape: f32[1,32], index: 6, kind: input, shape index: {}]   ;;  %s870_s7 = inlined_call_operand.vmem [shape: f32[1,32], index: 7, kind: input, shape index: {}]   ;;  %s871_s8 = inlined_call_operand.hbm [shape: bf16[32,32], index: 8, kind: input, shape index: {}]   ;;  %s872_s9 = inlined_call_operand.hbm [shape: bf16[32,32], index: 9, kind: input, shape index: {}]   ;;  %s873_s10 = inlined_call_operand.vmem [shape: f32[1,32], index: 10, kind: input, shape index: {}]   ;;  %s874_s11 = inlined_call_operand.vmem [shape: f32[1,32], index: 11, kind: input, shape index: {}]   ;;  %s875_s12 = inlined_call_operand.vmem [shape: f32[1,32], index: 12, kind: input, shape index: {}]   ;;  %s876_s13 = inlined_call_operand.hbm [shape: f32[16,32], index: 13, kind: output, shape index: {}]  }
   0x1   :  { %19 = vsyncpa [#allocation6], 0 }
   0x2   :  { %20 = vsyncpa [#allocation9], 0 }
   0x3   :  { %21 = vsyncpa [#allocation12], 0 }
   0x4   :  { %22 = vsyncpa [#allocation4], 0  ;;  %s40_s27 = sshll.u32 %s864_s1, 4  ;;  %s695_s28 = smov [#allocation5]   ;;  %s41_s27 = int_to_ptr.hbm [resolvable:$true] %s40_s27 }
   0x5   :  { %s42_s29 = sshll.u32 %s695_s28, 4  ;;  %s696_s30 = smov 128   ;;  %s43_s29 = int_to_ptr.vmem [resolvable:$true] %s42_s29 }
   0x6   :  { %s697_s14 = smov 8   ;;  %s68_s17 = sshll.u32 %s867_s4, 4  ;;  %s69_s17 = int_to_ptr.hbm [resolvable:$true] %s68_s17 }
   0x7   :  { %48 = dma.hbm_to_vmem [thread:$0]  %s41_s27, 256, %s43_s29, [#allocation6], %s696_s30, %s696_s30, %s697_s14  }
   0x8   :  { %s698_s18 = smov [#allocation8]   ;;  %s27_s1 = sshll.u32 %s863_s0, 4  ;;  %s28_s1 = int_to_ptr.hbm [resolvable:$true] %s27_s1 }
   0x9   :  { %s70_s19 = sshll.u32 %s698_s18, 4  ;;  %s699_s22 = smov 64   ;;  %s71_s19 = int_to_ptr.vmem [resolvable:$true] %s70_s19 }
   0xa   :  { %s700_s23 = smov 4   ;;  %s53_s26 = sshll.u32 %s865_s2, 4  ;;  %s54_s26 = int_to_ptr.hbm [resolvable:$true] %s53_s26 }
   0xb   :  { %76 = dma.hbm_to_vmem [thread:$0]  %s69_s17, 256, %s71_s19, [#allocation9], %s699_s22, %s699_s22, %s700_s23  }
   0xc   :  { %s701_s27 = smov [#allocation2]   ;;  %s702_s4 = smov [#allocation7]  }
   0xd   :  { %s29_s28 = sshll.u32 %s701_s27, 4  ;;  %s55_s29 = sshll.u32 %s702_s4, 4  ;;  %s30_s28 = int_to_ptr.vmem [resolvable:$true] %s29_s28  ;;  %s56_s29 = int_to_ptr.vmem [resolvable:$true] %s55_s29 }
   0xe   :  { %35 = dma.hbm_to_vmem [thread:$0]  %s28_s1, 256, %s30_s28, [#allocation3], %s696_s30, %s696_s30, %s697_s14  }
   0xf   :  { %s87_s16 = sshll.u32 %s871_s8, 4  ;;  %s100_s2 = sshll.u32 %s872_s9, 4  ;;  %s88_s16 = int_to_ptr.hbm [resolvable:$true] %s87_s16  ;;  %s101_s2 = int_to_ptr.hbm [resolvable:$true] %s100_s2 }
  0x10   :  { %61 = dma.hbm_to_vmem [thread:$0]  %s54_s26, 128, %s56_s29, [#allocation6], %s699_s22, %s699_s22, %s700_s23  }
  0x11   :  { %s703_s19 = smov [#allocation10]   ;;  %s704_s21 = smov [#allocation11]  }
  0x12   :  { %s89_s20 = sshll.u32 %s703_s19, 4  ;;  %s102_s1 = sshll.u32 %s704_s21, 4  ;;  %s90_s20 = int_to_ptr.vmem [resolvable:$true] %s89_s20  ;;  %s103_s1 = int_to_ptr.vmem [resolvable:$true] %s102_s1 }
  0x13   :  { %95 = dma.hbm_to_vmem [thread:$0]  %s88_s16, 256, %s90_s20, [#allocation9], %s699_s22, %s699_s22, %s700_s23  }
  0x14   :  { %108 = dma.hbm_to_vmem [thread:$0]  %s101_s2, 256, %s103_s1, [#allocation12], %s699_s22, %s699_s22, %s700_s23  }
  0x15   :  { %685 = dma.done.wait [#allocation3], 256  }
  0x16   :  { %686 = vsyncadd [#allocation3], 4294967040 }
  0x17   :  { %687 = dma.done.wait [#allocation6], 384  }
  0x18   :  { %688 = vsyncadd [#allocation6], 4294966912 }
  0x19   :  { %689 = dma.done.wait [#allocation9], 512  }
  0x1a   :  { %690 = vsyncadd [#allocation9], 4294966784 }
  0x1b   :  { %691 = dma.done.wait [#allocation12], 256  }
  0x1c   :  { %692 = vsyncadd [#allocation12], 4294967040  ;;  %v481_v0 = vld [vmem:[#allocation7] sm:$0xff]  ;;  %v147_v1 = vld [vmem:[#allocation5] sm:$0xff]  ;;  %vm161_vm0 = vcmask 130048   ;;  %vm201_vm1 = vcmask 261120  }
  0x1d   :  { %v148_v2 = vld [vmem:[#allocation5 + $0x8] sm:$0xff]  ;;  %172 = vmatpush.bf16.msra.mxu0 %v481_v0  ;;  %v483_v4 = vld [vmem:[#allocation8 + $0x8] sm:$0xff]  ;;  %v482_v5 = vld [vmem:[#allocation8] sm:$0xff]  ;;  %v705_v27 = vmov 32.0   ;;  %s433_s15 = sshll.u32 %s876_s13, 4  ;;  %s434_s15 = int_to_ptr.hbm [resolvable:$true] %s433_s15 }
  0x1e   :  { %v149_v3 = vpack.c.bf16 %v148_v2, %v147_v1  ;;  %211 = vmatpush.bf16.msra.mxu1 %v483_v4  ;;  %v500_v7 = vld [vmem:[%s866_s3] ss:$0 sm:$0xff]  ;;  %507 = vrcp.f32 %v705_v27  ;;  %v484_v37 = vld [vmem:[#allocation10] sm:$0xff]  ;;  %v289_v42 = vld [vmem:[#allocation2 + $0x8] sm:$0xff] }
  0x1f   :  { %v501_v14 = vld [vmem:[%s868_s5] ss:$0 sm:$0xff]  ;;  %v487_v43 = vld [vmem:[#allocation11 + $0x8] sm:$0xff]  ;;  %v486_v46 = vld [vmem:[#allocation11] sm:$0xff] }
  0x20   :  { %453 = vmatmul.msk.bf16.vlgmr.msra.gmra.mxu0 %vm161_vm0, %v149_v3  ;;  %v485_v33 = vld [vmem:[#allocation10 + $0x8] sm:$0xff]  ;;  %321 = vmatpush.bf16.msra.mxu2 %v487_v43 }
  0x21   :  { %350 = vmatpush.bf16.msra.mxu3 %v485_v33  ;;  %v288_v41 = vld [vmem:[#allocation2] sm:$0xff] }
  0x22   :  { %212 = vmatpush.bf16.msra.mxu1 %v482_v5  ;;  %v290_v44 = vpack.c.bf16 %v289_v42, %v288_v41 }
  0x24   :  { %v508_v28 = vpop.eup %507  ;;  %322 = vmatpush.bf16.msra.mxu2 %v486_v46 }
  0x25   :  { %v228_v29 = vmul.f32 32.0, %v508_v28  ;;  %vm232_vm2 = vweird.f32 %v508_v28  ;;  %351 = vmatpush.bf16.msra.mxu3 %v484_v37 }
  0x27   :  { %v229_v30 = vsub.f32 1.0, %v228_v29 }
  0x28   :  { %480 = vmatmul.msk.bf16.vlgmr.msra.gmra.mxu3 %vm201_vm1, %v290_v44 }
  0x29   :  { %v230_v31 = vmul.f32 %v508_v28, %v229_v30 }
  0x2b   :  { %v231_v32 = vadd.f32 %v508_v28, %v230_v31 }
  0x2d   :  { %v822_v34 = vsel %vm232_vm2, %v508_v28, %v231_v32 }
  0x9d   :  { %v174_v6 = vpop.f32.mrf.mxu0 }
  0x9e   :  { %v175_v8 = vadd.f32 %v500_v7, %v174_v6 }
  0xa0   :  { %v179_v11 = vmax.f32 %v175_v8, 0.0 }
  0xa5   :  { %v176_v9 = vpop.f32.mrf.mxu0 }
  0xa6   :  { %v177_v10 = vadd.f32 %v500_v7, %v176_v9  ;;  %v502_v7 = vld [vmem:[%s869_s6] ss:$0 sm:$0xff] }
  0xa8   :  { %v180_v12 = vmax.f32 %v177_v10, 0.0 }
  0xaa   :  { %v181_v13 = vpack.c.bf16 %v180_v12, %v179_v11 }
  0xac   :  { %462 = vmatmul.msk.bf16.vlgmr.msra.gmra.mxu1 %vm201_vm1, %v181_v13  ;;  %v503_v13 = vld [vmem:[%s870_s7] ss:$0 sm:$0xff] }
 0x129   :  { %v214_v15 = vpop.f32.mrf.mxu1 }
 0x12a   :  { %v215_v16 = vadd.f32 %v501_v14, %v214_v15 }
 0x12c   :  { %v808_v17 = vmax.f32 %v215_v16, 0.0 }
 0x12e   :  { %v221_v18 = vsel %vm201_vm1, %v808_v17, 0.0  ;;  %v236_v19 = vmul.f32 %v808_v17, %v808_v17 }
 0x12f   :  { %222 = vadd.xlane.f32.xlu0 %v221_v18  ;;  %v353_v18 = vpop.f32.mrf.mxu3 }
 0x130   :  { %v238_v20 = vsel %vm201_vm1, %v236_v19, 0.0  ;;  %v504_v19 = vld [vmem:[%s873_s10] ss:$0 sm:$0xff] }
 0x131   :  { %v216_v21 = vpop.f32.mrf.mxu1  ;;  %239 = vadd.xlane.f32.xlu1 %v238_v20 }
 0x132   :  { %v217_v22 = vadd.f32 %v501_v14, %v216_v21 }
 0x134   :  { %v815_v23 = vmax.f32 %v217_v22, 0.0 }
 0x136   :  { %v224_v24 = vsel %vm201_vm1, %v815_v23, 0.0  ;;  %v237_v25 = vmul.f32 %v815_v23, %v815_v23 }
 0x137   :  { %225 = vadd.xlane.f32.xlu0 %v224_v24 }
 0x138   :  { %v241_v26 = vsel %vm201_vm1, %v237_v25, 0.0 }
 0x139   :  { %242 = vadd.xlane.f32.xlu1 %v241_v26  ;;  %v355_v26 = vpop.f32.mrf.mxu3 }
 0x1a2   :  { %v223_v35 = vpop.xlane.xlu0 %222 }
 0x1a3   :  { %v234_v36 = vmul.f32 %v822_v34, %v223_v35 }
 0x1a4   :  { %v240_v38 = vpop.xlane.xlu1 %239 }
 0x1a5   :  { %v246_v39 = vmul.f32 %v234_v36, %v234_v36  ;;  %v244_v40 = vmul.f32 %v240_v38, %v822_v34  ;;  %v252_v4 = vsub.f32 %v808_v17, %v234_v36 }
 0x1a7   :  { %v248_v45 = vsub.f32 %v244_v40, %v246_v39 }
 0x1a9   :  { %v250_v47 = vmax.f32 %v248_v45, 0.0 }
 0x1aa   :  { %v226_v48 = vpop.xlane.xlu0 %225 }
 0x1ab   :  { %v254_v49 = vadd.f32 1e-05, %v250_v47  ;;  %v235_v50 = vmul.f32 %v822_v34, %v226_v48 }
 0x1ac   :  { %v243_v51 = vpop.xlane.xlu1 %242 }
 0x1ad   :  { %509 = vrsqrt.f32 %v254_v49  ;;  %v247_v52 = vmul.f32 %v235_v50, %v235_v50  ;;  %v245_v53 = vmul.f32 %v243_v51, %v822_v34  ;;  %vm262_vm4 = vweird.f32 %v254_v49 }
 0x1ae   :  { %v253_v9 = vsub.f32 %v815_v23, %v235_v50 }
 0x1af   :  { %v249_v54 = vsub.f32 %v245_v53, %v247_v52 }
 0x1b1   :  { %v251_v55 = vmax.f32 %v249_v54, 0.0 }
 0x1b3   :  { %v510_v56 = vpop.eup %509  ;;  %v255_v58 = vadd.f32 1e-05, %v251_v55 }
 0x1b4   :  { %v257_v57 = vmul.f32 %v510_v56, %v254_v49  ;;  %vm263_vm3 = vweird.f32 %v510_v56 }
 0x1b5   :  { %511 = vrsqrt.f32 %v255_v58  ;;  %vm264_vm5 = vmor %vm262_vm4, %vm263_vm3  ;;  %vm272_vm7 = vweird.f32 %v255_v58 }
 0x1b6   :  { %v258_v59 = vmul.f32 %v510_v56, %v257_v57 }
 0x1b8   :  { %v259_v60 = vmul.f32 0.5, %v258_v59 }
 0x1ba   :  { %v260_v61 = vsub.f32 1.5, %v259_v60 }
 0x1bb   :  { %v512_v62 = vpop.eup %511 }
 0x1bc   :  { %v261_v63 = vmul.f32 %v510_v56, %v260_v61  ;;  %v267_v0 = vmul.f32 %v512_v62, %v255_v58  ;;  %vm273_vm6 = vweird.f32 %v512_v62 }
 0x1bd   :  { %vm274_vm8 = vmor %vm272_vm7, %vm273_vm6 }
 0x1be   :  { %v268_v1 = vmul.f32 %v512_v62, %v267_v0  ;;  %v265_v3 = vsel %vm264_vm5, %v510_v56, %v261_v63  ;;  %v506_v0 = vld [vmem:[%s875_s12] ss:$0 sm:$0xff] }
 0x1bf   :  { %v276_v6 = vmul.f32 %v265_v3, %v252_v4 }
 0x1c0   :  { %v269_v2 = vmul.f32 0.5, %v268_v1 }
 0x1c1   :  { %v281_v12 = vmul.f32 %v502_v7, %v276_v6 }
 0x1c2   :  { %v270_v5 = vsub.f32 1.5, %v269_v2 }
 0x1c3   :  { %v286_v15 = vadd.f32 %v503_v13, %v281_v12 }
 0x1c4   :  { %v271_v8 = vmul.f32 %v512_v62, %v270_v5 }
 0x1c6   :  { %v275_v10 = vsel %vm274_vm8, %v512_v62, %v271_v8 }
 0x1c7   :  { %v277_v11 = vmul.f32 %v275_v10, %v253_v9 }
 0x1c9   :  { %v282_v14 = vmul.f32 %v502_v7, %v277_v11 }
 0x1cb   :  { %v287_v16 = vadd.f32 %v503_v13, %v282_v14 }
 0x1cd   :  { %v295_v17 = vpack.c.bf16 %v287_v16, %v286_v15 }
 0x1cf   :  { %471 = vmatmul.msk.bf16.vlgmr.msra.gmra.mxu2 %vm201_vm1, %v295_v17 }
 0x252   :  { %v324_v20 = vpop.f32.mrf.mxu2 }
 0x253   :  { %v354_v21 = vadd.f32 %v353_v18, %v324_v20 }
 0x255   :  { %v361_v22 = vadd.f32 %v504_v19, %v354_v21 }
 0x257   :  { %v363_v23 = vmax.f32 %v361_v22, 0.0 }
 0x259   :  { %v365_v24 = vsel %vm201_vm1, %v363_v23, 0.0  ;;  %v373_v25 = vmul.f32 %v363_v23, %v363_v23 }
 0x25a   :  { %366 = vadd.xlane.f32.xlu2 %v365_v24  ;;  %v326_v27 = vpop.f32.mrf.mxu2 }
 0x25b   :  { %v356_v28 = vadd.f32 %v355_v26, %v326_v27  ;;  %v375_v29 = vsel %vm201_vm1, %v373_v25, 0.0 }
 0x25c   :  { %376 = vadd.xlane.f32.xlu0 %v375_v29 }
 0x25d   :  { %v362_v30 = vadd.f32 %v504_v19, %v356_v28 }
 0x25f   :  { %v364_v31 = vmax.f32 %v362_v30, 0.0 }
 0x261   :  { %v368_v32 = vsel %vm201_vm1, %v364_v31, 0.0  ;;  %v374_v33 = vmul.f32 %v364_v31, %v364_v31 }
 0x262   :  { %369 = vadd.xlane.f32.xlu2 %v368_v32 }
 0x263   :  { %v378_v35 = vsel %vm201_vm1, %v374_v33, 0.0 }
 0x264   :  { %379 = vadd.xlane.f32.xlu1 %v378_v35 }
 0x2cd   :  { %v367_v36 = vpop.xlane.xlu2 %366 }
 0x2ce   :  { %v371_v37 = vmul.f32 %v367_v36, %v822_v34 }
 0x2cf   :  { %v377_v38 = vpop.xlane.xlu0 %376 }
 0x2d0   :  { %v383_v39 = vmul.f32 %v371_v37, %v371_v37  ;;  %v381_v40 = vmul.f32 %v377_v38, %v822_v34  ;;  %v389_v59 = vsub.f32 %v363_v23, %v371_v37 }
 0x2d2   :  { %v385_v41 = vsub.f32 %v381_v40, %v383_v39 }
 0x2d4   :  { %v387_v42 = vmax.f32 %v385_v41, 0.0 }
 0x2d5   :  { %v370_v43 = vpop.xlane.xlu2 %369 }
 0x2d6   :  { %v391_v44 = vadd.f32 1e-05, %v387_v42  ;;  %v372_v45 = vmul.f32 %v370_v43, %v822_v34 }
 0x2d7   :  { %v380_v46 = vpop.xlane.xlu1 %379 }
 0x2d8   :  { %513 = vrsqrt.f32 %v391_v44  ;;  %v384_v47 = vmul.f32 %v372_v45, %v372_v45  ;;  %v382_v48 = vmul.f32 %v380_v46, %v822_v34  ;;  %vm399_vm10 = vweird.f32 %v391_v44  ;;  %v505_v34 = vld [vmem:[%s874_s11] ss:$0 sm:$0xff]  ;;  %s706_s11 = smov [#allocation13]  }
 0x2d9   :  { %v390_v6 = vsub.f32 %v364_v31, %v372_v45  ;;  %s431_s4 = sshll.u32 %s706_s11, 4  ;;  %s432_s4 = int_to_ptr.vmem [resolvable:$true] %s431_s4 }
 0x2da   :  { %v386_v49 = vsub.f32 %v382_v48, %v384_v47 }
 0x2dc   :  { %v388_v50 = vmax.f32 %v386_v49, 0.0 }
 0x2de   :  { %v514_v51 = vpop.eup %513  ;;  %v392_v53 = vadd.f32 1e-05, %v388_v50 }
 0x2df   :  { %v394_v52 = vmul.f32 %v514_v51, %v391_v44  ;;  %vm400_vm9 = vweird.f32 %v514_v51 }
 0x2e0   :  { %515 = vrsqrt.f32 %v392_v53  ;;  %vm401_vm11 = vmor %vm399_vm10, %vm400_vm9  ;;  %vm409_vm13 = vweird.f32 %v392_v53 }
 0x2e1   :  { %v395_v54 = vmul.f32 %v514_v51, %v394_v52 }
 0x2e3   :  { %v396_v55 = vmul.f32 0.5, %v395_v54 }
 0x2e5   :  { %v397_v56 = vsub.f32 1.5, %v396_v55 }
 0x2e6   :  { %v516_v57 = vpop.eup %515 }
 0x2e7   :  { %v398_v58 = vmul.f32 %v514_v51, %v397_v56  ;;  %v404_v60 = vmul.f32 %v516_v57, %v392_v53  ;;  %vm410_vm12 = vweird.f32 %v516_v57 }
 0x2e8   :  { %vm411_vm14 = vmor %vm409_vm13, %vm410_vm12 }
 0x2e9   :  { %v402_v61 = vsel %vm401_vm11, %v514_v51, %v398_v58  ;;  %v405_v63 = vmul.f32 %v516_v57, %v404_v60 }
 0x2ea   :  { %v413_v62 = vmul.f32 %v402_v61, %v389_v59 }
 0x2eb   :  { %v406_v1 = vmul.f32 0.5, %v405_v63 }
 0x2ec   :  { %v418_v2 = vmul.f32 %v505_v34, %v413_v62 }
 0x2ed   :  { %v407_v3 = vsub.f32 1.5, %v406_v1 }
 0x2ee   :  { %v423_v4 = vadd.f32 %v506_v0, %v418_v2 }
 0x2ef   :  { %v408_v5 = vmul.f32 %v516_v57, %v407_v3 }
 0x2f0   :  { %425 = vst.msk [vmem:[#allocation13] sm:$0xff] %vm201_vm1, %v423_v4 }
 0x2f1   :  { %v412_v7 = vsel %vm411_vm14, %v516_v57, %v408_v5 }
 0x2f2   :  { %v414_v8 = vmul.f32 %v412_v7, %v390_v6 }
 0x2f4   :  { %v419_v9 = vmul.f32 %v505_v34, %v414_v8 }
 0x2f6   :  { %v424_v10 = vadd.f32 %v506_v0, %v419_v9 }
 0x2f8   :  { %426 = vst.msk [vmem:[#allocation13 + $0x8] sm:$0xff] %vm201_vm1, %v424_v10 }
 0x2f9   :  { %439 = dma.vmem_to_hbm [thread:$0]  %s432_s4, 256, %s434_s15, [#allocation4], %s696_s30, %s696_s30, %s697_s14  }
 0x2fa   :  { %693 = dma.done.wait [#allocation4], 256  }
 0x2fb   :  { %694 = vsyncadd [#allocation4], 4294967040 }
 0x2fc   :  { %444 = vsyncpa [#allocation3], 1 }
 0x2fd   :  { %445 = vsyncpa [#allocation6], 1 }
 0x2fe   :  { %446 = vsyncpa [#allocation9], 1 }
 0x2ff   :  { %447 = vsyncpa [#allocation12], 1 }
 0x300   :  { %448 = vsyncpa [#allocation4], 1 }

</bundles_post_ra>
